<compile_context>
chip_gen: v6e
topology: v6e:2x2x1
jax: 0.10.0
libtpu: 0.0.40
codegen_flags: <defaults>
</compile_context>

<pallas_src>
import functools

import jax
import jax.numpy as jnp
from jax.experimental import pallas as pl
from jax.experimental.pallas import tpu as pltpu


def _round_up(x, m):
    return ((x + m - 1) // m) * m


def _critic_kernel(s_ref, a_ref, w1s_ref, w1a_ref, w2_ref, w3_ref, bias_ref,
                   q_ref, *, compute_dtype):
    # Packed biases (f32): row 0 = b1, row 1 = b2, row 2 lane 0 = b3.
    bias = bias_ref[...]                      # (8, hidden_pad)
    b1 = bias[0:1, :]
    b2 = bias[1:2, :]
    b3 = bias[2:3, 0:1]

    # fc1 with the concat fused as split-K: [s, a] @ w1 == s @ w1_s + a @ w1_a
    h = (jnp.dot(s_ref[...], w1s_ref[...], preferred_element_type=jnp.float32)
         + jnp.dot(a_ref[...], w1a_ref[...], preferred_element_type=jnp.float32)
         + b1)
    h = jnp.maximum(h, 0.0).astype(compute_dtype)

    # fc2
    h = jnp.dot(h, w2_ref[...], preferred_element_type=jnp.float32) + b2
    h = jnp.maximum(h, 0.0).astype(compute_dtype)

    # fc3 head: narrow (bb, 1) output; the masked store hides under the fc2
    # matmul and avoids a 128x padded HBM writeback.
    # The reference computes q2 with the same fc1/fc2/fc3 weights, so we
    # compute once and the wrapper returns it for both q1 and q2.
    q_ref[...] = jnp.dot(h, w3_ref[...], preferred_element_type=jnp.float32) + b3


def prepare_critic_params(params, s_dim, *, compute_dtype=jnp.bfloat16):
    """One-time packing of Critic params for the Pallas kernel.

    * hidden padded to a multiple of 128 (full-width MXU, lane-aligned tiles).
    * w1 pre-split at s_dim (no unaligned in-kernel slice).
    * b1/b2/b3 packed into a single (8, hidden_pad) f32 tile -> one tiny DMA.
    * weights cast to `compute_dtype` (bf16 by default) for the MXU inputs;
      accumulation stays f32 inside the kernel.
    """
    w1 = jnp.asarray(params["w1"], jnp.float32)
    w2 = jnp.asarray(params["w2"], jnp.float32)
    w3 = jnp.asarray(params["w3"], jnp.float32)
    b1 = jnp.asarray(params["b1"], jnp.float32).reshape(1, -1)
    b2 = jnp.asarray(params["b2"], jnp.float32).reshape(1, -1)
    b3 = jnp.asarray(params["b3"], jnp.float32).reshape(1, -1)

    n_states, hidden = w1.shape
    a_dim = n_states - s_dim
    assert a_dim > 0
    hidden_pad = _round_up(hidden, 128)
    ph = hidden_pad - hidden

    w1_p = jnp.pad(w1, ((0, 0), (0, ph)))
    w1_s = w1_p[:s_dim, :].astype(compute_dtype)
    w1_a = w1_p[s_dim:, :].astype(compute_dtype)
    w2_p = jnp.pad(w2, ((0, ph), (0, ph))).astype(compute_dtype)
    w3_p = jnp.pad(w3, ((0, ph), (0, 0))).astype(compute_dtype)

    bias = jnp.zeros((8, hidden_pad), jnp.float32)
    bias = bias.at[0, :hidden].set(b1[0])
    bias = bias.at[1, :hidden].set(b2[0])
    bias = bias.at[2, 0].set(b3[0, 0])

    return {"w1_s": w1_s, "w1_a": w1_a, "w2": w2_p, "w3": w3_p, "bias": bias,
            "s_dim": s_dim, "a_dim": a_dim, "hidden_pad": hidden_pad,
            "compute_dtype": jnp.dtype(compute_dtype)}


def critic_forward(s, a, prepared, *, block_b=2048):
    """Full Critic forward pass in a single Pallas kernel.

    Returns (q1, q2), each (B, 1) float32; q1 == q2 as in the reference module.
    """
    B, s_dim = s.shape
    a_dim = a.shape[1]
    assert s_dim == prepared["s_dim"] and a_dim == prepared["a_dim"]
    compute_dtype = prepared["compute_dtype"]
    hidden_pad = prepared["hidden_pad"]
    n_states = s_dim + a_dim

    s = s.astype(compute_dtype)
    a = a.astype(compute_dtype)

    # --- batch tiling --------------------------------------------------------
    if B <= 256:
        n_blocks = 1
        bb = _round_up(max(B, 1), 8)
    else:
        # >= 2 blocks so both v7x TensorCores get work; rebalance so a batch
        # just over a block boundary doesn't double its padding.
        bb = max(8, min(block_b, _round_up(pl.cdiv(B, 2), 8)))
        n_blocks = pl.cdiv(B, bb)
        bb = _round_up(pl.cdiv(B, n_blocks), 8)
    Bp = n_blocks * bb
    pad = Bp - B
    if pad:
        s = jnp.pad(s, ((0, pad), (0, 0)))
        a = jnp.pad(a, ((0, pad), (0, 0)))

    # --- VMEM budget: raise the scoped limit only when the block needs it ----
    itemsize = jnp.dtype(compute_dtype).itemsize
    weight_bytes = ((n_states + hidden_pad + 1) * hidden_pad * itemsize
                    + 8 * hidden_pad * 4)
    io_bytes = 2 * bb * (n_states * itemsize + 128 * 4)   # double-buffered in/out
    act_bytes = 4 * bb * hidden_pad * 4                   # f32 intermediates headroom
    estimate = 2 * weight_bytes + io_bytes + act_bytes + (2 << 20)
    cp_kwargs = dict(dimension_semantics=("parallel",))
    if estimate > (16 << 20):                             # above v5e default scope
        cp_kwargs["vmem_limit_bytes"] = int(min(max(estimate, 32 << 20), 64 << 20))

    kernel = functools.partial(_critic_kernel, compute_dtype=compute_dtype)

    out = pl.pallas_call(
        kernel,
        out_shape=jax.ShapeDtypeStruct((Bp, 1), jnp.float32),
        grid=(n_blocks,),
        in_specs=[
            pl.BlockSpec((bb, s_dim), lambda i: (i, 0)),               # s tile
            pl.BlockSpec((bb, a_dim), lambda i: (i, 0)),               # a tile
            pl.BlockSpec((s_dim, hidden_pad), lambda i: (0, 0)),       # w1[:s_dim]
            pl.BlockSpec((a_dim, hidden_pad), lambda i: (0, 0)),       # w1[s_dim:]
            pl.BlockSpec((hidden_pad, hidden_pad), lambda i: (0, 0)),  # w2
            pl.BlockSpec((hidden_pad, 1), lambda i: (0, 0)),           # w3
            pl.BlockSpec((8, hidden_pad), lambda i: (0, 0)),           # packed biases
        ],
        out_specs=pl.BlockSpec((bb, 1), lambda i: (i, 0)),
        compiler_params=pltpu.CompilerParams(**cp_kwargs),
    )(s, a, prepared["w1_s"], prepared["w1_a"], prepared["w2"],
      prepared["w3"], prepared["bias"])

    q = out[:B] if pad else out
    # Reference computes q2 through the identical fc1/fc2/fc3 chain -> q2 == q1.
    return q, q


def init_critic_params(key, n_states, hidden_dim):
    """Mimics PyTorch nn.Linear default init (uniform +-1/sqrt(fan_in)).

    Weights stored as (in_features, out_features). fc4/fc5/fc6 are initialized
    for parity with the module's __init__ but unused in forward() (as in the
    reference).
    """
    def linear(key, fan_in, fan_out):
        kw, kb = jax.random.split(key)
        bound = 1.0 / jnp.sqrt(jnp.float32(fan_in))
        w = jax.random.uniform(kw, (fan_in, fan_out), jnp.float32, -bound, bound)
        b = jax.random.uniform(kb, (1, fan_out), jnp.float32, -bound, bound)
        return w, b

    keys = jax.random.split(key, 6)
    w1, b1 = linear(keys[0], n_states, hidden_dim)
    w2, b2 = linear(keys[1], hidden_dim, hidden_dim)
    w3, b3 = linear(keys[2], hidden_dim, 1)
    w4, b4 = linear(keys[3], n_states, hidden_dim)    # unused in forward
    w5, b5 = linear(keys[4], hidden_dim, hidden_dim)  # unused in forward
    w6, b6 = linear(keys[5], hidden_dim, 1)           # unused in forward
    return {"w1": w1, "b1": b1, "w2": w2, "b2": b2, "w3": w3, "b3": b3,
            "w4": w4, "b4": b4, "w5": w5, "b5": b5, "w6": w6, "b6": b6}


def _reference(s, a, params):
    sa = jnp.concatenate([s, a], axis=1)
    h = jnp.maximum(sa @ params["w1"] + params["b1"], 0.0)
    h = jnp.maximum(h @ params["w2"] + params["b2"], 0.0)
    return h @ params["w3"] + params["b3"]


if __name__ == "__main__":
    # Small shapes consistent with the module: n_states = s_dim + a_dim.
    B, s_dim, a_dim, hidden = 2, 6, 2, 32
    n_states = s_dim + a_dim

    key = jax.random.PRNGKey(0)
    k_s, k_a, k_p = jax.random.split(key, 3)
    s = jax.random.normal(k_s, (B, s_dim), jnp.float32)
    a = jax.random.normal(k_a, (B, a_dim), jnp.float32)
    params = init_critic_params(k_p, n_states, hidden)
    q_ref = _reference(s, a, params)

    # f32 compute path -- tight correctness check (single tiny block).
    prep_f32 = prepare_critic_params(params, s_dim, compute_dtype=jnp.float32)
    q1, q2 = critic_forward(s, a, prep_f32)
    jax.block_until_ready((q1, q2))
    assert q1.shape == (B, 1) and q2.shape == (B, 1)
    assert jnp.allclose(q1, q_ref, atol=1e-5) and jnp.allclose(q2, q_ref, atol=1e-5)

    # bf16 compute path (default, perf config) -- looser tolerance.
    prep_bf16 = prepare_critic_params(params, s_dim)
    q1b, q2b = critic_forward(s, a, prep_bf16)
    jax.block_until_ready((q1b, q2b))
    assert jnp.allclose(q1b, q_ref, rtol=5e-2, atol=1e-1)
    assert jnp.allclose(q2b, q_ref, rtol=5e-2, atol=1e-1)

    # Larger batch exercising the multi-block grid + padding + rebalanced bb.
    Bl = 1000
    k_s2, k_a2 = jax.random.split(jax.random.PRNGKey(1))
    s2 = jax.random.normal(k_s2, (Bl, s_dim), jnp.float32)
    a2 = jax.random.normal(k_a2, (Bl, a_dim), jnp.float32)
    q_ref_l = _reference(s2, a2, params)
    q1l, q2l = critic_forward(s2, a2, prep_f32, block_b=256)
    jax.block_until_ready((q1l, q2l))
    assert q1l.shape == (Bl, 1)
    assert jnp.allclose(q1l, q_ref_l, atol=1e-4) and jnp.allclose(q2l, q_ref_l, atol=1e-4)

    print("KERNEL_OK")
</pallas_src>

<mosaic_0001>
module attributes {stable_mosaic.version = 11 : i64} {
  func.func @_critic_kernel(%arg0: i32, %arg1: memref<8x6xf32, #tpu.memory_space<vmem>>, %arg2: memref<8x2xf32, #tpu.memory_space<vmem>>, %arg3: memref<6x128xf32, #tpu.memory_space<vmem>>, %arg4: memref<2x128xf32, #tpu.memory_space<vmem>>, %arg5: memref<128x128xf32, #tpu.memory_space<vmem>>, %arg6: memref<128x1xf32, #tpu.memory_space<vmem>>, %arg7: memref<8x128xf32, #tpu.memory_space<vmem>>, %arg8: memref<8x1xf32, #tpu.memory_space<vmem>>) attributes {dimension_semantics = [#tpu.dimension_semantics<parallel>], iteration_bounds = array<i64: 1>, scalar_prefetch = 0 : i64, scratch_operands = 0 : i64, tpu.core_type = #tpu.core_type<tc>, window_params = [{transform_indices = @transform_0, window_bounds = array<i64: 8, 6>}, {transform_indices = @transform_1, window_bounds = array<i64: 8, 2>}, {pipeline_mode = #tpu.pipeline_mode<synchronous>, transform_indices = @transform_2, window_bounds = array<i64: 6, 128>}, {pipeline_mode = #tpu.pipeline_mode<synchronous>, transform_indices = @transform_3, window_bounds = array<i64: 2, 128>}, {pipeline_mode = #tpu.pipeline_mode<synchronous>, transform_indices = @transform_4, window_bounds = array<i64: 128, 128>}, {pipeline_mode = #tpu.pipeline_mode<synchronous>, transform_indices = @transform_5, window_bounds = array<i64: 128, 1>}, {pipeline_mode = #tpu.pipeline_mode<synchronous>, transform_indices = @transform_6, window_bounds = array<i64: 8, 128>}, {transform_indices = @transform_7, window_bounds = array<i64: 8, 1>}]} {
    %c0 = arith.constant 0 : index
    %c0_0 = arith.constant 0 : index
    %0 = vector.load %arg7[%c0, %c0_0] : memref<8x128xf32, #tpu.memory_space<vmem>>, vector<8x128xf32>
    %1 = vector.extract_strided_slice %0 {offsets = [0, 0], sizes = [1, 128], strides = [1, 1]} : vector<8x128xf32> to vector<1x128xf32>
    %2 = vector.extract_strided_slice %0 {offsets = [1, 0], sizes = [1, 128], strides = [1, 1]} : vector<8x128xf32> to vector<1x128xf32>
    %3 = vector.extract_strided_slice %0 {offsets = [2, 0], sizes = [1, 1], strides = [1, 1]} : vector<8x128xf32> to vector<1x1xf32>
    %c0_1 = arith.constant 0 : index
    %c0_2 = arith.constant 0 : index
    %4 = vector.load %arg1[%c0_1, %c0_2] : memref<8x6xf32, #tpu.memory_space<vmem>>, vector<8x6xf32>
    %c0_3 = arith.constant 0 : index
    %c0_4 = arith.constant 0 : index
    %5 = vector.load %arg3[%c0_3, %c0_4] : memref<6x128xf32, #tpu.memory_space<vmem>>, vector<6x128xf32>
    %cst = arith.constant dense<0.000000e+00> : vector<8x128xf32>
    %6 = tpu.matmul %4, %5, %cst {dimension_numbers = #tpu.dot_dimension_numbers<[1], [0], [0], [1], [0, 0, 1, 1], [], []>} : vector<8x6xf32>, vector<6x128xf32>, vector<8x128xf32> -> vector<8x128xf32>
    %c0_5 = arith.constant 0 : index
    %c0_6 = arith.constant 0 : index
    %7 = vector.load %arg2[%c0_5, %c0_6] : memref<8x2xf32, #tpu.memory_space<vmem>>, vector<8x2xf32>
    %c0_7 = arith.constant 0 : index
    %c0_8 = arith.constant 0 : index
    %8 = vector.load %arg4[%c0_7, %c0_8] : memref<2x128xf32, #tpu.memory_space<vmem>>, vector<2x128xf32>
    %cst_9 = arith.constant dense<0.000000e+00> : vector<8x128xf32>
    %9 = tpu.matmul %7, %8, %cst_9 {dimension_numbers = #tpu.dot_dimension_numbers<[1], [0], [0], [1], [0, 0, 1, 1], [], []>} : vector<8x2xf32>, vector<2x128xf32>, vector<8x128xf32> -> vector<8x128xf32>
    %10 = arith.addf %6, %9 : vector<8x128xf32>
    %11 = vector.broadcast %1 : vector<1x128xf32> to vector<8x128xf32>
    %12 = arith.addf %10, %11 : vector<8x128xf32>
    %cst_10 = arith.constant 0.000000e+00 : f32
    %13 = vector.broadcast %cst_10 : f32 to vector<8x128xf32>
    %14 = arith.maximumf %12, %13 : vector<8x128xf32>
    %c0_11 = arith.constant 0 : index
    %c0_12 = arith.constant 0 : index
    %15 = vector.load %arg5[%c0_11, %c0_12] : memref<128x128xf32, #tpu.memory_space<vmem>>, vector<128x128xf32>
    %cst_13 = arith.constant dense<0.000000e+00> : vector<8x128xf32>
    %16 = tpu.matmul %14, %15, %cst_13 {dimension_numbers = #tpu.dot_dimension_numbers<[1], [0], [0], [1], [0, 0, 1, 1], [], []>} : vector<8x128xf32>, vector<128x128xf32>, vector<8x128xf32> -> vector<8x128xf32>
    %17 = vector.broadcast %2 : vector<1x128xf32> to vector<8x128xf32>
    %18 = arith.addf %16, %17 : vector<8x128xf32>
    %cst_14 = arith.constant 0.000000e+00 : f32
    %19 = vector.broadcast %cst_14 : f32 to vector<8x128xf32>
    %20 = arith.maximumf %18, %19 : vector<8x128xf32>
    %c0_15 = arith.constant 0 : index
    %c0_16 = arith.constant 0 : index
    %21 = vector.load %arg6[%c0_15, %c0_16] : memref<128x1xf32, #tpu.memory_space<vmem>>, vector<128x1xf32>
    %cst_17 = arith.constant dense<0.000000e+00> : vector<8x1xf32>
    %22 = tpu.matmul %20, %21, %cst_17 {dimension_numbers = #tpu.dot_dimension_numbers<[1], [0], [0], [1], [0, 0, 1, 1], [], []>} : vector<8x128xf32>, vector<128x1xf32>, vector<8x1xf32> -> vector<8x1xf32>
    %23 = vector.broadcast %3 : vector<1x1xf32> to vector<8x1xf32>
    %24 = arith.addf %22, %23 : vector<8x1xf32>
    %c0_18 = arith.constant 0 : index
    %c0_19 = arith.constant 0 : index
    %25 = vector.load %arg8[%c0_18, %c0_19] : memref<8x1xf32, #tpu.memory_space<vmem>>, vector<8x1xf32>
    tpu.vector_store %arg8[%c0_18, %c0_19], %24 {strides = array<i32>} : memref<8x1xf32, #tpu.memory_space<vmem>>, vector<8x1xf32>,
    return
  }
  func.func @transform_0(%arg0: i32) -> (i32, i32) {
    %c0_i32 = arith.constant 0 : i32
    %c0_i32_0 = arith.constant 0 : i32
    return %arg0, %c0_i32 : i32, i32
  }
  func.func @transform_1(%arg0: i32) -> (i32, i32) {
    %c0_i32 = arith.constant 0 : i32
    %c0_i32_0 = arith.constant 0 : i32
    return %arg0, %c0_i32 : i32, i32
  }
  func.func @transform_2(%arg0: i32) -> (i32, i32) {
    %c0_i32 = arith.constant 0 : i32
    %c0_i32_0 = arith.constant 0 : i32
    %c0_i32_1 = arith.constant 0 : i32
    return %c0_i32, %c0_i32_0 : i32, i32
  }
  func.func @transform_3(%arg0: i32) -> (i32, i32) {
    %c0_i32 = arith.constant 0 : i32
    %c0_i32_0 = arith.constant 0 : i32
    %c0_i32_1 = arith.constant 0 : i32
    return %c0_i32, %c0_i32_0 : i32, i32
  }
  func.func @transform_4(%arg0: i32) -> (i32, i32) {
    %c0_i32 = arith.constant 0 : i32
    %c0_i32_0 = arith.constant 0 : i32
    %c0_i32_1 = arith.constant 0 : i32
    return %c0_i32, %c0_i32_0 : i32, i32
  }
  func.func @transform_5(%arg0: i32) -> (i32, i32) {
    %c0_i32 = arith.constant 0 : i32
    %c0_i32_0 = arith.constant 0 : i32
    %c0_i32_1 = arith.constant 0 : i32
    return %c0_i32, %c0_i32_0 : i32, i32
  }
  func.func @transform_6(%arg0: i32) -> (i32, i32) {
    %c0_i32 = arith.constant 0 : i32
    %c0_i32_0 = arith.constant 0 : i32
    %c0_i32_1 = arith.constant 0 : i32
    return %c0_i32, %c0_i32_0 : i32, i32
  }
  func.func @transform_7(%arg0: i32) -> (i32, i32) {
    %c0_i32 = arith.constant 0 : i32
    %c0_i32_0 = arith.constant 0 : i32
    return %arg0, %c0_i32 : i32, i32
  }
}

</mosaic_0001>

<bundles_post_ra>
// kernel: tpu_custom_call.1
= control target key start
LH: loop header
LB: loop body
LE: loop exit
PB: predicated region body
PF: predicated region fallthrough
CT: control target
= control target key end

     0   :  { %12 = vsyncpa [#allocation3], 0  ;;  %s540_s24 = smov [#allocation2]   ;;  %s739_s0 = inlined_call_operand.vmem [shape: f32[8,6], index: 0, kind: input, shape index: {}]   ;;  %s740_s1 = inlined_call_operand.vmem [shape: f32[8,2], index: 1, kind: input, shape index: {}]   ;;  %s741_s2 = inlined_call_operand.vmem [shape: f32[6,128], index: 2, kind: input, shape index: {}]   ;;  %s742_s3 = inlined_call_operand.vmem [shape: f32[2,128], index: 3, kind: input, shape index: {}]   ;;  %s743_s4 = inlined_call_operand.vmem [shape: f32[128,128], index: 4, kind: input, shape index: {}]   ;;  %s744_s5 = inlined_call_operand.vmem [shape: f32[128,1], index: 5, kind: input, shape index: {}]   ;;  %s745_s6 = inlined_call_operand.hbm [shape: f32[8,128], index: 6, kind: input, shape index: {}]   ;;  %s746_s7 = inlined_call_operand.vmem [shape: f32[8,1], index: 7, kind: output, shape index: {}]  }
   0x1   :  { %s31_s25 = sshll.u32 %s540_s24, 4  ;;  %s32_s25 = int_to_ptr.vmem [resolvable:$true] %s31_s25 }
   0x2   :  { %s526_s26 = scalar_lea.vmem %s32_s25, 128  ;;  %p531_p1 = scmp.lt.s32.totalorder %s32_s25, %s32_s25 }
   0x3   :  { %p527_p0 = scmp.ne.s32.totalorder %s32_s25, %s526_s26  ;;  %p532_p2 = scmp.lt.s32.totalorder %s526_s26, %s526_s26 }
   0x5   :  { %p533_p3 = por %p532_p2, %p531_p1 }
   0x7   :  { %p534_p4 = pnand %p533_p3, %p527_p0 }
   0x9   :  { %537 = shalt.err (!%p534_p4)
}
   0xa   :  { %34 = dma.hbm_to_vmem [thread:$0]  %s745_s6, 128, %s32_s25, [#allocation3]  }
   0xb   :  { %538 = dma.done.wait [#allocation3], 128  }
   0xc   :  { %539 = vsyncadd [#allocation3], 4294967168  ;;  %v541_v0 = vmov 0.0   ;;  %vm542_vm0 = vmmov 0   ;;  %vm47_vm1 = vcmask 1041408   ;;  %vm125_vm2 = vcmask 1045504  }
   0xd   :  { %435 = vmatprep.subr.mxu0 %v541_v0  ;;  %440 = vmatprep.subr.mxu1 %v541_v0  ;;  %vm43_vm3 = vcmask 15360   ;;  %vm121_vm4 = vcmask 48128   ;;  %v42_v1 = vld [vmem:[%s742_s3] sm:$0x3]  ;;  %v220_v5 = vld [vmem:[%s743_s4 + $0x78] sm:$0xff]  ;;  %v219_v6 = vld [vmem:[%s743_s4 + $0x70] sm:$0xff]  ;;  %v199_v34 = vlaneseq }
   0xe   :  { %437 = vmatprep.mubr.msk.f32.mxu0 %vm542_vm0, %v541_v0  ;;  %442 = vmatprep.mubr.msk.f32.mxu1 %vm542_vm0, %v541_v0  ;;  %v40_v2 = vld [vmem:[%s741_s2] sm:$0x3f]  ;;  %v218_v7 = vld [vmem:[%s743_s4 + $0x68] sm:$0xff]  ;;  %v216_v9 = vld [vmem:[%s743_s4 + $0x58] sm:$0xff]  ;;  %vm386_vm5 = vcmask 7168  }
   0xf   :  { %v41_v3 = vld [vmem:[%s740_s1] sm:$0xff]  ;;  %436 = vmatpush3.msk.msra.mxu0 %vm47_vm1, %v42_v1  ;;  %441 = vmatpush3.msk.msra.mxu1 %vm125_vm2, %v40_v2  ;;  %v215_v10 = vld [vmem:[%s743_s4 + $0x50] sm:$0xff]  ;;  %v214_v11 = vld [vmem:[%s743_s4 + $0x48] sm:$0xff]  ;;  %v200_v35 = vshrl.u32 %v199_v34, 7 }
  0x10   :  { %v39_v4 = vld [vmem:[%s739_s0] sm:$0xff]  ;;  %438 = vmatmul.mubr.msk.f32.vlgmr.msra.gmra.mxu0 %vm43_vm3, %v41_v3  ;;  %445 = vmatprep.subr.mxu0 %v541_v0  ;;  %v212_v13 = vld [vmem:[%s743_s4 + $0x38] sm:$0xff]  ;;  %v211_v14 = vld [vmem:[%s743_s4 + $0x30] sm:$0xff] }
  0x11   :  { %443 = vmatmul.mubr.msk.f32.vlgmr.msra.gmra.mxu1 %vm121_vm4, %v39_v4  ;;  %477 = vmatprep.mubr.msk.f32.mxu0 %vm542_vm0, %v541_v0  ;;  %v217_v8 = vld [vmem:[%s743_s4 + $0x60] sm:$0xff]  ;;  %v210_v15 = vld [vmem:[%s743_s4 + $0x28] sm:$0xff]  ;;  %v208_v17 = vld [vmem:[%s743_s4 + $0x18] sm:$0xff]  ;;  %v201_v36 = vsub.s32 0, %v200_v35  ;;  %v223_v49 = vsub.s32 1, %v200_v35  ;;  %v314_v55 = vsub.s32 2, %v200_v35 }
  0x12   :  { %446 = vmatpush3.msra.mxu0 %v220_v5  ;;  %480 = vmatprep.subr.mxu1 %v541_v0  ;;  %v213_v12 = vld [vmem:[%s743_s4 + $0x40] sm:$0xff]  ;;  %v207_v18 = vld [vmem:[%s743_s4 + $0x10] sm:$0xff]  ;;  %v206_v19 = vld [vmem:[%s743_s4 + $0x8] sm:$0xff] }
  0x13   :  { %447 = vmatprep.subr.mxu0 %v541_v0  ;;  %512 = vmatprep.mubr.msk.f32.mxu1 %vm542_vm0, %v541_v0  ;;  %v209_v16 = vld [vmem:[%s743_s4 + $0x20] sm:$0xff]  ;;  %v311_v21 = vld [vmem:[%s744_s5 + $0x78] sm:$0xff]  ;;  %v310_v22 = vld [vmem:[%s744_s5 + $0x70] sm:$0xff] }
  0x14   :  { %448 = vmatpush3.msra.mxu0 %v219_v6  ;;  %v205_v20 = vld [vmem:[%s743_s4] sm:$0xff]  ;;  %481 = vmatpush3.msra.mxu1 %v311_v21  ;;  %v309_v23 = vld [vmem:[%s744_s5 + $0x68] sm:$0xff]  ;;  %v307_v25 = vld [vmem:[%s744_s5 + $0x58] sm:$0xff] }
  0x15   :  { %449 = vmatprep.subr.mxu0 %v541_v0  ;;  %482 = vmatprep.subr.mxu1 %v541_v0  ;;  %v308_v24 = vld [vmem:[%s744_s5 + $0x60] sm:$0xff]  ;;  %v306_v26 = vld [vmem:[%s744_s5 + $0x50] sm:$0xff]  ;;  %v305_v27 = vld [vmem:[%s744_s5 + $0x48] sm:$0xff] }
  0x16   :  { %450 = vmatpush3.msra.mxu0 %v218_v7  ;;  %483 = vmatpush3.msra.mxu1 %v310_v22  ;;  %v304_v28 = vld [vmem:[%s744_s5 + $0x40] sm:$0xff]  ;;  %v303_v29 = vld [vmem:[%s744_s5 + $0x38] sm:$0xff]  ;;  %v302_v30 = vld [vmem:[%s744_s5 + $0x30] sm:$0xff] }
  0x17   :  { %451 = vmatprep.subr.mxu0 %v541_v0  ;;  %484 = vmatprep.subr.mxu1 %v541_v0  ;;  %v301_v31 = vld [vmem:[%s744_s5 + $0x28] sm:$0xff]  ;;  %v300_v32 = vld [vmem:[%s744_s5 + $0x20] sm:$0xff]  ;;  %v299_v33 = vld [vmem:[%s744_s5 + $0x18] sm:$0xff] }
  0x18   :  { %452 = vmatpush3.msra.mxu0 %v217_v8  ;;  %485 = vmatpush3.msra.mxu1 %v309_v23  ;;  %v38_v37 = vld [vmem:[#allocation2] sm:$0xff]  ;;  %v298_v46 = vld [vmem:[%s744_s5 + $0x10] sm:$0xff]  ;;  %v297_v47 = vld [vmem:[%s744_s5 + $0x8] sm:$0xff] }
  0x19   :  { %453 = vmatprep.subr.mxu0 %v541_v0  ;;  %486 = vmatprep.subr.mxu1 %v541_v0  ;;  %v202_v38 = vrot.slane %v38_v37, %v201_v36  ;;  %v296_v48 = vld [vmem:[%s744_s5] sm:$0xff]  ;;  %v224_v50 = vrot.slane %v38_v37, %v223_v49  ;;  %v315_v56 = vrot.slane %v38_v37, %v314_v55 }
  0x1a   :  { %454 = vmatpush3.msra.mxu0 %v216_v9  ;;  %487 = vmatpush3.msra.mxu1 %v308_v24 }
  0x1b   :  { %455 = vmatprep.subr.mxu0 %v541_v0  ;;  %488 = vmatprep.subr.mxu1 %v541_v0 }
  0x1c   :  { %456 = vmatpush3.msra.mxu0 %v215_v10  ;;  %489 = vmatpush3.msra.mxu1 %v307_v25 }
  0x1d   :  { %457 = vmatprep.subr.mxu0 %v541_v0  ;;  %490 = vmatprep.subr.mxu1 %v541_v0 }
  0x1e   :  { %458 = vmatpush3.msra.mxu0 %v214_v11  ;;  %491 = vmatpush3.msra.mxu1 %v306_v26 }
  0x1f   :  { %459 = vmatprep.subr.mxu0 %v541_v0  ;;  %492 = vmatprep.subr.mxu1 %v541_v0 }
  0x20   :  { %460 = vmatpush3.msra.mxu0 %v213_v12  ;;  %493 = vmatpush3.msra.mxu1 %v305_v27 }
  0x21   :  { %461 = vmatprep.subr.mxu0 %v541_v0  ;;  %494 = vmatprep.subr.mxu1 %v541_v0 }
  0x22   :  { %462 = vmatpush3.msra.mxu0 %v212_v13  ;;  %495 = vmatpush3.msra.mxu1 %v304_v28 }
  0x23   :  { %463 = vmatprep.subr.mxu0 %v541_v0  ;;  %496 = vmatprep.subr.mxu1 %v541_v0 }
  0x24   :  { %464 = vmatpush3.msra.mxu0 %v211_v14  ;;  %497 = vmatpush3.msra.mxu1 %v303_v29 }
  0x25   :  { %465 = vmatprep.subr.mxu0 %v541_v0  ;;  %498 = vmatprep.subr.mxu1 %v541_v0 }
  0x26   :  { %466 = vmatpush3.msra.mxu0 %v210_v15  ;;  %499 = vmatpush3.msra.mxu1 %v302_v30 }
  0x27   :  { %467 = vmatprep.subr.mxu0 %v541_v0  ;;  %500 = vmatprep.subr.mxu1 %v541_v0 }
  0x28   :  { %468 = vmatpush3.msra.mxu0 %v209_v16  ;;  %501 = vmatpush3.msra.mxu1 %v301_v31 }
  0x29   :  { %469 = vmatprep.subr.mxu0 %v541_v0  ;;  %502 = vmatprep.subr.mxu1 %v541_v0 }
  0x2a   :  { %470 = vmatpush3.msra.mxu0 %v208_v17  ;;  %503 = vmatpush3.msra.mxu1 %v300_v32 }
  0x2b   :  { %471 = vmatprep.subr.mxu0 %v541_v0  ;;  %504 = vmatprep.subr.mxu1 %v541_v0 }
  0x2c   :  { %472 = vmatpush3.msra.mxu0 %v207_v18  ;;  %505 = vmatpush3.msra.mxu1 %v299_v33 }
  0x2d   :  { %473 = vmatprep.subr.mxu0 %v541_v0  ;;  %506 = vmatprep.subr.mxu1 %v541_v0 }
  0x2e   :  { %474 = vmatpush3.msra.mxu0 %v206_v19  ;;  %507 = vmatpush3.msra.mxu1 %v298_v46 }
  0x2f   :  { %475 = vmatprep.subr.mxu0 %v541_v0  ;;  %508 = vmatprep.subr.mxu1 %v541_v0 }
  0x30   :  { %476 = vmatpush3.msra.mxu0 %v205_v20  ;;  %509 = vmatpush3.msra.mxu1 %v297_v47 }
  0x31   :  { %510 = vmatprep.subr.mxu1 %v541_v0 }
  0x32   :  { %511 = vmatpush3.msra.mxu1 %v296_v48 }
  0xd0   :  { %v117_v39 = vpop.f32.mrf.mxu0 }
  0xd1   :  { %v195_v40 = vpop.f32.mrf.mxu1 }
  0xd2   :  { %v196_v41 = vadd.f32 %v195_v40, %v117_v39  ;;  %v439_v42 = vpop.f32.mrf.mxu0 }
  0xd3   :  { %v444_v43 = vpop.f32.mrf.mxu1 }
  0xd4   :  { %v203_v44 = vadd.f32 %v202_v38, %v196_v41 }
  0xd6   :  { %v204_v45 = vmax.f32 %v203_v44, 0.0 }
  0xd8   :  { %478 = vmatmul.mubr.f32.vlgmr.msra.gmra.mxu0 %v204_v45 }
 0x198   :  { %v291_v51 = vpop.f32.mrf.mxu0 }
 0x199   :  { %v292_v52 = vadd.f32 %v291_v51, %v224_v50 }
 0x19a   :  { %v479_v53 = vpop.f32.mrf.mxu0 }
 0x19b   :  { %v295_v54 = vmax.f32 %v292_v52, 0.0 }
 0x19d   :  { %513 = vmatmul.mubr.f32.vlgmr.msra.gmra.mxu1 %v295_v54 }
 0x25d   :  { %v382_v57 = vpop.f32.mrf.mxu1 }
 0x25e   :  { %v383_v58 = vadd.f32 %v382_v57, %v315_v56 }
 0x25f   :  { %v514_v59 = vpop.f32.mrf.mxu1 }
 0x260   :  { %387 = vst.msk [vmem:[%s746_s7] sm:$0xff] %vm386_vm5, %v383_v58 }
 0x261   :  { %392 = vsyncpa [#allocation3], 1 }

</bundles_post_ra>
